<compile_context>
chip_gen: v7x
topology: tpu7x:2x2x1
jax: 0.10.0
libtpu: 0.0.40
codegen_flags: <defaults>
</compile_context>

<pallas_src>
import functools

import jax
import jax.numpy as jnp
from jax.experimental import pallas as pl
from jax.experimental.pallas import tpu as pltpu

LANE = 128  # TPU lane width


def _round_up(x, m):
    return (x + m - 1) // m * m


# ----------------------------------------------------------------------------
# Kernel
# ----------------------------------------------------------------------------
def _fused_forward_kernel(
    x_ref,                      # [BT, Din_pad] bf16  (batch tile of concat(sound, vib), lane-padded)
    w1_ref, b1_ref,             # [Din_pad, 256] bf16, [1, 256] f32   (blockdiag fc1)
    scale_ref, shift_ref,       # [1, 256] f32                         (folded BN, both branches)
    w2_ref, b2_ref,             # [256, 128] bf16, [1, 128] f32        (blockdiag fc2)
    wf1_ref, bf1_ref,           # [128, 64]  bf16, [1, 64]  f32        (fusion_fc1)
    wf2_ref, bf2_ref,           # [64, 128]  bf16, [1, 128] f32        (fusion_fc2, lane-padded)
    out_ref,                    # [BT, 128]  f32
):
    bf16 = jnp.bfloat16

    # layer 1 (both branches at once): relu(x @ blockdiag(Ws1, Wv1) + b1), then folded BN
    h1 = jnp.dot(x_ref[...], w1_ref[...], preferred_element_type=jnp.float32)
    h1 = jnp.maximum(h1 + b1_ref[...], 0.0)
    h1 = h1 * scale_ref[...] + shift_ref[...]            # BatchNorm1d (eval, folded)
    # dropout (eval) = identity

    # layer 2 (both branches): result is already concat(sound_64, vib_64)
    h2 = jnp.dot(h1.astype(bf16), w2_ref[...], preferred_element_type=jnp.float32)
    h2 = jnp.maximum(h2 + b2_ref[...], 0.0)              # [BT, 128]

    # fusion_fc1: relu(concat @ Wf1 + bf1)
    f = jnp.dot(h2.astype(bf16), wf1_ref[...], preferred_element_type=jnp.float32)
    f = jnp.maximum(f + bf1_ref[...], 0.0)               # [BT, 64]

    # classifier head (lane-padded to 128 output columns -> unmasked full-lane stores)
    out = jnp.dot(f.astype(bf16), wf2_ref[...], preferred_element_type=jnp.float32)
    out_ref[...] = (out + bf2_ref[...]).astype(out_ref.dtype)


# ----------------------------------------------------------------------------
# Parameter packing (host side, once)
# ----------------------------------------------------------------------------
def pack_params(p):
    """Build block-diagonal / lane-padded, bf16-matmul-ready parameters from the
    natural per-branch parameter dict (linear weights stored as [in, out])."""
    bf16 = jnp.bfloat16
    ds = p["ws1"].shape[0]
    dv = p["wv1"].shape[0]
    din = ds + dv
    din_pad = _round_up(din, LANE)          # lane-dense input feature dim
    nc = p["wf2"].shape[1]
    nc_pad = _round_up(nc, LANE)            # lane-dense classifier output

    # blockdiag(Ws1, Wv1), zero-padded rows: [Din_pad, 256]  (exact: padded rows are 0)
    w1 = jnp.zeros((din_pad, 256), jnp.float32)
    w1 = w1.at[:ds, :128].set(p["ws1"]).at[ds:din, 128:].set(p["wv1"])
    b1 = jnp.concatenate([p["bs1"], p["bv1"]], axis=1)           # [1, 256]
    scale = jnp.concatenate([p["s_scale"], p["v_scale"]], axis=1)
    shift = jnp.concatenate([p["s_shift"], p["v_shift"]], axis=1)

    # blockdiag(Ws2, Wv2): [256, 128]  (output = concat(sound_64, vib_64))
    w2 = jnp.zeros((256, 128), jnp.float32)
    w2 = w2.at[:128, :64].set(p["ws2"]).at[128:, 64:].set(p["wv2"])
    b2 = jnp.concatenate([p["bs2"], p["bv2"]], axis=1)           # [1, 128]

    # lane-dense head: pad num_classes -> nc_pad with zero columns
    wf2 = jnp.zeros((64, nc_pad), jnp.float32).at[:, :nc].set(p["wf2"])
    bf2 = jnp.zeros((1, nc_pad), jnp.float32).at[:, :nc].set(p["bf2"])

    return dict(
        w1=w1.astype(bf16), b1=b1, scale=scale, shift=shift,
        w2=w2.astype(bf16), b2=b2,
        wf1=p["wf1"].astype(bf16), bf1=p["bf1"],
        wf2=wf2.astype(bf16), bf2=bf2,
        num_classes=nc, din=din,
    )


# ----------------------------------------------------------------------------
# Wrapper
# ----------------------------------------------------------------------------
def sound_vibration_transformer_forward(sound, vibration, packed, *, block_b=512):
    """sound: [B, ...] (flattened like torch .view(B, -1)), vibration: [B, Dv].
    Returns logits [B, num_classes] (f32)."""
    B = sound.shape[0]
    sound = sound.reshape(B, -1)
    nc = packed["num_classes"]
    din = packed["din"]
    din_pad = packed["w1"].shape[0]
    nc_pad = packed["wf2"].shape[1]

    # matmul operands in bf16; concat the two inputs once (block-diagonal w1 consumes both)
    x = jnp.concatenate([sound, vibration], axis=1).astype(jnp.bfloat16)   # [B, Din]

    # Batch tile: multiple of 8 sublanes; pad batch up to a multiple of the tile.
    bt = min(block_b, _round_up(B, 8))
    b_pad = _round_up(B, bt)
    pad_rows = b_pad - B
    pad_cols = din_pad - din
    if pad_rows or pad_cols:
        x = jnp.pad(x, ((0, pad_rows), (0, pad_cols)))            # zero pads are exact
    grid = (b_pad // bt,)

    tiled = lambda i: (i, 0)      # activations / output: batch-tiled
    resident = lambda i: (0, 0)   # weights / biases: same block every step -> VMEM-resident

    # VMEM budget (per step, double-buffered activations + resident weights):
    #   2*(bt*din_pad*2 + bt*nc_pad*4) + ~0.2 MiB weights  << 32 MiB even at bt=512,
    #   comfortably inside v7x's 64 MiB physical VMEM.
    out = pl.pallas_call(
        _fused_forward_kernel,
        out_shape=jax.ShapeDtypeStruct((b_pad, nc_pad), jnp.float32),
        grid=grid,
        in_specs=[
            pl.BlockSpec((bt, din_pad), tiled),
            pl.BlockSpec((din_pad, 256), resident),
            pl.BlockSpec((1, 256), resident),
            pl.BlockSpec((1, 256), resident),
            pl.BlockSpec((1, 256), resident),
            pl.BlockSpec((256, 128), resident),
            pl.BlockSpec((1, 128), resident),
            pl.BlockSpec((128, 64), resident),
            pl.BlockSpec((1, 64), resident),
            pl.BlockSpec((64, nc_pad), resident),
            pl.BlockSpec((1, nc_pad), resident),
        ],
        out_specs=pl.BlockSpec((bt, nc_pad), tiled),
        compiler_params=pltpu.CompilerParams(
            dimension_semantics=("parallel",),   # shards batch tiles across TCs on v7x
            vmem_limit_bytes=32 << 20,
        ),
    )(
        x,
        packed["w1"], packed["b1"], packed["scale"], packed["shift"],
        packed["w2"], packed["b2"],
        packed["wf1"], packed["bf1"],
        packed["wf2"], packed["bf2"],
    )
    return out[:B, :nc]


# ----------------------------------------------------------------------------
# Synthetic parameters + plain-JAX reference (mirrors the PyTorch eval forward)
# ----------------------------------------------------------------------------
def make_params(key, sound_input_dim, vibration_input_dim, num_classes):
    """Deterministic synthetic parameters matching the PyTorch module shapes.
    Linear weights stored pre-transposed as [in, out]."""
    ks = jax.random.split(key, 20)
    init = lambda k, shape: (0.05 * jax.random.normal(k, shape)).astype(jnp.float32)
    eps = 1e-5

    def folded_bn(kg, kb, km, kv):
        gamma = 1.0 + 0.1 * jax.random.normal(kg, (128,))
        beta = 0.1 * jax.random.normal(kb, (128,))
        r_mean = 0.1 * jax.random.normal(km, (128,))
        r_var = 1.0 + 0.1 * jax.random.uniform(kv, (128,))
        scale = gamma / jnp.sqrt(r_var + eps)
        shift = beta - r_mean * scale
        return (scale.reshape(1, 128).astype(jnp.float32),
                shift.reshape(1, 128).astype(jnp.float32))

    s_scale, s_shift = folded_bn(ks[12], ks[13], ks[14], ks[15])
    v_scale, v_shift = folded_bn(ks[16], ks[17], ks[18], ks[19])

    return dict(
        ws1=init(ks[0], (sound_input_dim, 128)), bs1=init(ks[1], (1, 128)),
        s_scale=s_scale, s_shift=s_shift,
        ws2=init(ks[2], (128, 64)), bs2=init(ks[3], (1, 64)),
        wv1=init(ks[4], (vibration_input_dim, 128)), bv1=init(ks[5], (1, 128)),
        v_scale=v_scale, v_shift=v_shift,
        wv2=init(ks[6], (128, 64)), bv2=init(ks[7], (1, 64)),
        wf1=init(ks[8], (128, 64)), bf1=init(ks[9], (1, 64)),
        wf2=init(ks[10], (64, num_classes)), bf2=init(ks[11], (1, num_classes)),
    )


def reference_forward(sound, vibration, p):
    """Plain-JAX reference mirroring the PyTorch eval-mode forward, with the
    same bf16-operand / f32-accumulate matmul numerics as the kernel."""
    bf16 = jnp.bfloat16
    mm = lambda a, w: jnp.dot(a.astype(bf16), w.astype(bf16),
                              preferred_element_type=jnp.float32)
    s = sound.reshape(sound.shape[0], -1)
    s = jnp.maximum(mm(s, p["ws1"]) + p["bs1"], 0.0)
    s = s * p["s_scale"] + p["s_shift"]
    s = jnp.maximum(mm(s, p["ws2"]) + p["bs2"], 0.0)
    v = jnp.maximum(mm(vibration, p["wv1"]) + p["bv1"], 0.0)
    v = v * p["v_scale"] + p["v_shift"]
    v = jnp.maximum(mm(v, p["wv2"]) + p["bv2"], 0.0)
    c = jnp.concatenate([s, v], axis=1)
    f = jnp.maximum(mm(c, p["wf1"]) + p["bf1"], 0.0)
    return mm(f, p["wf2"]) + p["bf2"]


# ----------------------------------------------------------------------------
if __name__ == "__main__":
    B = 8
    sound_input_dim = 32
    vibration_input_dim = 32
    num_classes = 5

    key = jax.random.PRNGKey(0)
    k_sound, k_vib, k_params = jax.random.split(key, 3)

    # sound arrives as [B, 1, sound_input_dim]; .view(B, -1) flatten is done in the wrapper
    sound = jax.random.normal(k_sound, (B, 1, sound_input_dim), dtype=jnp.float32)
    vibration = jax.random.normal(k_vib, (B, vibration_input_dim), dtype=jnp.float32)

    params = make_params(k_params, sound_input_dim, vibration_input_dim, num_classes)
    packed = pack_params(params)

    fwd = functools.partial(sound_vibration_transformer_forward, block_b=512)
    out = fwd(sound, vibration, packed)
    out = jax.block_until_ready(out)

    ref = reference_forward(sound, vibration, params)
    assert out.shape == (B, num_classes), out.shape
    assert jnp.allclose(out, ref, atol=2e-3, rtol=2e-3), (
        "mismatch vs reference: max abs err = "
        + str(float(jnp.max(jnp.abs(out - ref)))))

    print("KERNEL_OK")
</pallas_src>

<mosaic_0001>
module attributes {stable_mosaic.version = 11 : i64} {
  func.func @_fused_forward_kernel(%arg0: i32, %arg1: memref<8x128xbf16, #tpu.memory_space<vmem>>, %arg2: memref<128x256xbf16, #tpu.memory_space<vmem>>, %arg3: memref<1x256xf32, #tpu.memory_space<vmem>>, %arg4: memref<1x256xf32, #tpu.memory_space<vmem>>, %arg5: memref<1x256xf32, #tpu.memory_space<vmem>>, %arg6: memref<256x128xbf16, #tpu.memory_space<vmem>>, %arg7: memref<1x128xf32, #tpu.memory_space<vmem>>, %arg8: memref<128x64xbf16, #tpu.memory_space<vmem>>, %arg9: memref<1x64xf32, #tpu.memory_space<vmem>>, %arg10: memref<64x128xbf16, #tpu.memory_space<vmem>>, %arg11: memref<1x128xf32, #tpu.memory_space<vmem>>, %arg12: memref<8x128xf32, #tpu.memory_space<vmem>>) attributes {dimension_semantics = [#tpu.dimension_semantics<parallel>], iteration_bounds = array<i64: 1>, scalar_prefetch = 0 : i64, scratch_operands = 0 : i64, tpu.core_type = #tpu.core_type<tc>, window_params = [{transform_indices = @transform_0, window_bounds = array<i64: 8, 128>}, {pipeline_mode = #tpu.pipeline_mode<synchronous>, transform_indices = @transform_1, window_bounds = array<i64: 128, 256>}, {pipeline_mode = #tpu.pipeline_mode<synchronous>, transform_indices = @transform_2, window_bounds = array<i64: 1, 256>}, {pipeline_mode = #tpu.pipeline_mode<synchronous>, transform_indices = @transform_3, window_bounds = array<i64: 1, 256>}, {pipeline_mode = #tpu.pipeline_mode<synchronous>, transform_indices = @transform_4, window_bounds = array<i64: 1, 256>}, {pipeline_mode = #tpu.pipeline_mode<synchronous>, transform_indices = @transform_5, window_bounds = array<i64: 256, 128>}, {pipeline_mode = #tpu.pipeline_mode<synchronous>, transform_indices = @transform_6, window_bounds = array<i64: 1, 128>}, {pipeline_mode = #tpu.pipeline_mode<synchronous>, transform_indices = @transform_7, window_bounds = array<i64: 128, 64>}, {pipeline_mode = #tpu.pipeline_mode<synchronous>, transform_indices = @transform_8, window_bounds = array<i64: 1, 64>}, {pipeline_mode = #tpu.pipeline_mode<synchronous>, transform_indices = @transform_9, window_bounds = array<i64: 64, 128>}, {pipeline_mode = #tpu.pipeline_mode<synchronous>, transform_indices = @transform_10, window_bounds = array<i64: 1, 128>}, {transform_indices = @transform_11, window_bounds = array<i64: 8, 128>}]} {
    %c0 = arith.constant 0 : index
    %c0_0 = arith.constant 0 : index
    %0 = vector.load %arg1[%c0, %c0_0] : memref<8x128xbf16, #tpu.memory_space<vmem>>, vector<8x128xbf16>
    %c0_1 = arith.constant 0 : index
    %c0_2 = arith.constant 0 : index
    %1 = vector.load %arg2[%c0_1, %c0_2] : memref<128x256xbf16, #tpu.memory_space<vmem>>, vector<128x256xbf16>
    %cst = arith.constant dense<0.000000e+00> : vector<8x256xf32>
    %2 = tpu.matmul %0, %1, %cst {dimension_numbers = #tpu.dot_dimension_numbers<[1], [0], [0], [1], [0, 0, 1, 1], [], []>} : vector<8x128xbf16>, vector<128x256xbf16>, vector<8x256xf32> -> vector<8x256xf32>
    %c0_3 = arith.constant 0 : index
    %c0_4 = arith.constant 0 : index
    %3 = vector.load %arg3[%c0_3, %c0_4] : memref<1x256xf32, #tpu.memory_space<vmem>>, vector<1x256xf32>
    %4 = vector.broadcast %3 : vector<1x256xf32> to vector<8x256xf32>
    %5 = arith.addf %2, %4 : vector<8x256xf32>
    %cst_5 = arith.constant 0.000000e+00 : f32
    %6 = vector.broadcast %cst_5 : f32 to vector<8x256xf32>
    %7 = arith.maximumf %5, %6 : vector<8x256xf32>
    %c0_6 = arith.constant 0 : index
    %c0_7 = arith.constant 0 : index
    %8 = vector.load %arg4[%c0_6, %c0_7] : memref<1x256xf32, #tpu.memory_space<vmem>>, vector<1x256xf32>
    %9 = vector.broadcast %8 : vector<1x256xf32> to vector<8x256xf32>
    %10 = arith.mulf %7, %9 : vector<8x256xf32>
    %c0_8 = arith.constant 0 : index
    %c0_9 = arith.constant 0 : index
    %11 = vector.load %arg5[%c0_8, %c0_9] : memref<1x256xf32, #tpu.memory_space<vmem>>, vector<1x256xf32>
    %12 = vector.broadcast %11 : vector<1x256xf32> to vector<8x256xf32>
    %13 = arith.addf %10, %12 : vector<8x256xf32>
    %14 = arith.truncf %13 : vector<8x256xf32> to vector<8x256xbf16>
    %c0_10 = arith.constant 0 : index
    %c0_11 = arith.constant 0 : index
    %15 = vector.load %arg6[%c0_10, %c0_11] : memref<256x128xbf16, #tpu.memory_space<vmem>>, vector<256x128xbf16>
    %cst_12 = arith.constant dense<0.000000e+00> : vector<8x128xf32>
    %16 = tpu.matmul %14, %15, %cst_12 {dimension_numbers = #tpu.dot_dimension_numbers<[1], [0], [0], [1], [0, 0, 1, 1], [], []>} : vector<8x256xbf16>, vector<256x128xbf16>, vector<8x128xf32> -> vector<8x128xf32>
    %c0_13 = arith.constant 0 : index
    %c0_14 = arith.constant 0 : index
    %17 = vector.load %arg7[%c0_13, %c0_14] : memref<1x128xf32, #tpu.memory_space<vmem>>, vector<1x128xf32>
    %18 = vector.broadcast %17 : vector<1x128xf32> to vector<8x128xf32>
    %19 = arith.addf %16, %18 : vector<8x128xf32>
    %cst_15 = arith.constant 0.000000e+00 : f32
    %20 = vector.broadcast %cst_15 : f32 to vector<8x128xf32>
    %21 = arith.maximumf %19, %20 : vector<8x128xf32>
    %22 = arith.truncf %21 : vector<8x128xf32> to vector<8x128xbf16>
    %c0_16 = arith.constant 0 : index
    %c0_17 = arith.constant 0 : index
    %23 = vector.load %arg8[%c0_16, %c0_17] : memref<128x64xbf16, #tpu.memory_space<vmem>>, vector<128x64xbf16>
    %cst_18 = arith.constant dense<0.000000e+00> : vector<8x64xf32>
    %24 = tpu.matmul %22, %23, %cst_18 {dimension_numbers = #tpu.dot_dimension_numbers<[1], [0], [0], [1], [0, 0, 1, 1], [], []>} : vector<8x128xbf16>, vector<128x64xbf16>, vector<8x64xf32> -> vector<8x64xf32>
    %c0_19 = arith.constant 0 : index
    %c0_20 = arith.constant 0 : index
    %25 = vector.load %arg9[%c0_19, %c0_20] : memref<1x64xf32, #tpu.memory_space<vmem>>, vector<1x64xf32>
    %26 = vector.broadcast %25 : vector<1x64xf32> to vector<8x64xf32>
    %27 = arith.addf %24, %26 : vector<8x64xf32>
    %cst_21 = arith.constant 0.000000e+00 : f32
    %28 = vector.broadcast %cst_21 : f32 to vector<8x64xf32>
    %29 = arith.maximumf %27, %28 : vector<8x64xf32>
    %30 = arith.truncf %29 : vector<8x64xf32> to vector<8x64xbf16>
    %c0_22 = arith.constant 0 : index
    %c0_23 = arith.constant 0 : index
    %31 = vector.load %arg10[%c0_22, %c0_23] : memref<64x128xbf16, #tpu.memory_space<vmem>>, vector<64x128xbf16>
    %cst_24 = arith.constant dense<0.000000e+00> : vector<8x128xf32>
    %32 = tpu.matmul %30, %31, %cst_24 {dimension_numbers = #tpu.dot_dimension_numbers<[1], [0], [0], [1], [0, 0, 1, 1], [], []>} : vector<8x64xbf16>, vector<64x128xbf16>, vector<8x128xf32> -> vector<8x128xf32>
    %c0_25 = arith.constant 0 : index
    %c0_26 = arith.constant 0 : index
    %33 = vector.load %arg11[%c0_25, %c0_26] : memref<1x128xf32, #tpu.memory_space<vmem>>, vector<1x128xf32>
    %34 = vector.broadcast %33 : vector<1x128xf32> to vector<8x128xf32>
    %35 = arith.addf %32, %34 : vector<8x128xf32>
    %c0_27 = arith.constant 0 : index
    %c0_28 = arith.constant 0 : index
    %36 = vector.load %arg12[%c0_27, %c0_28] : memref<8x128xf32, #tpu.memory_space<vmem>>, vector<8x128xf32>
    tpu.vector_store %arg12[%c0_27, %c0_28], %35 {strides = array<i32>} : memref<8x128xf32, #tpu.memory_space<vmem>>, vector<8x128xf32>,
    return
  }
  func.func @transform_0(%arg0: i32) -> (i32, i32) {
    %c0_i32 = arith.constant 0 : i32
    %c0_i32_0 = arith.constant 0 : i32
    return %arg0, %c0_i32 : i32, i32
  }
  func.func @transform_1(%arg0: i32) -> (i32, i32) {
    %c0_i32 = arith.constant 0 : i32
    %c0_i32_0 = arith.constant 0 : i32
    %c0_i32_1 = arith.constant 0 : i32
    return %c0_i32, %c0_i32_0 : i32, i32
  }
  func.func @transform_2(%arg0: i32) -> (i32, i32) {
    %c0_i32 = arith.constant 0 : i32
    %c0_i32_0 = arith.constant 0 : i32
    %c0_i32_1 = arith.constant 0 : i32
    return %c0_i32, %c0_i32_0 : i32, i32
  }
  func.func @transform_3(%arg0: i32) -> (i32, i32) {
    %c0_i32 = arith.constant 0 : i32
    %c0_i32_0 = arith.constant 0 : i32
    %c0_i32_1 = arith.constant 0 : i32
    return %c0_i32, %c0_i32_0 : i32, i32
  }
  func.func @transform_4(%arg0: i32) -> (i32, i32) {
    %c0_i32 = arith.constant 0 : i32
    %c0_i32_0 = arith.constant 0 : i32
    %c0_i32_1 = arith.constant 0 : i32
    return %c0_i32, %c0_i32_0 : i32, i32
  }
  func.func @transform_5(%arg0: i32) -> (i32, i32) {
    %c0_i32 = arith.constant 0 : i32
    %c0_i32_0 = arith.constant 0 : i32
    %c0_i32_1 = arith.constant 0 : i32
    return %c0_i32, %c0_i32_0 : i32, i32
  }
  func.func @transform_6(%arg0: i32) -> (i32, i32) {
    %c0_i32 = arith.constant 0 : i32
    %c0_i32_0 = arith.constant 0 : i32
    %c0_i32_1 = arith.constant 0 : i32
    return %c0_i32, %c0_i32_0 : i32, i32
  }
  func.func @transform_7(%arg0: i32) -> (i32, i32) {
    %c0_i32 = arith.constant 0 : i32
    %c0_i32_0 = arith.constant 0 : i32
    %c0_i32_1 = arith.constant 0 : i32
    return %c0_i32, %c0_i32_0 : i32, i32
  }
  func.func @transform_8(%arg0: i32) -> (i32, i32) {
    %c0_i32 = arith.constant 0 : i32
    %c0_i32_0 = arith.constant 0 : i32
    %c0_i32_1 = arith.constant 0 : i32
    return %c0_i32, %c0_i32_0 : i32, i32
  }
  func.func @transform_9(%arg0: i32) -> (i32, i32) {
    %c0_i32 = arith.constant 0 : i32
    %c0_i32_0 = arith.constant 0 : i32
    %c0_i32_1 = arith.constant 0 : i32
    return %c0_i32, %c0_i32_0 : i32, i32
  }
  func.func @transform_10(%arg0: i32) -> (i32, i32) {
    %c0_i32 = arith.constant 0 : i32
    %c0_i32_0 = arith.constant 0 : i32
    %c0_i32_1 = arith.constant 0 : i32
    return %c0_i32, %c0_i32_0 : i32, i32
  }
  func.func @transform_11(%arg0: i32) -> (i32, i32) {
    %c0_i32 = arith.constant 0 : i32
    %c0_i32_0 = arith.constant 0 : i32
    return %arg0, %c0_i32 : i32, i32
  }
}

</mosaic_0001>

<bundles_post_ra>
// kernel: tpu_custom_call.1
= control target key start
LH: loop header
LB: loop body
LE: loop exit
PB: predicated region body
PF: predicated region fallthrough
CT: control target
= control target key end

     0   :  { %16 = vsyncpa [#allocation3], 0  ;;  %s1067_s0 = inlined_call_operand.vmem [shape: bf16[8,128], index: 0, kind: input, shape index: {}]   ;;  %s1068_s1 = inlined_call_operand.hbm [shape: bf16[128,256], index: 1, kind: input, shape index: {}]   ;;  %s1069_s2 = inlined_call_operand.vmem [shape: f32[1,256], index: 2, kind: input, shape index: {}]   ;;  %s1070_s3 = inlined_call_operand.vmem [shape: f32[1,256], index: 3, kind: input, shape index: {}]   ;;  %s1071_s4 = inlined_call_operand.vmem [shape: f32[1,256], index: 4, kind: input, shape index: {}]   ;;  %s1072_s5 = inlined_call_operand.hbm [shape: bf16[256,128], index: 5, kind: input, shape index: {}]   ;;  %s1073_s6 = inlined_call_operand.vmem [shape: f32[1,128], index: 6, kind: input, shape index: {}]   ;;  %s1074_s7 = inlined_call_operand.vmem [shape: bf16[128,64], index: 7, kind: input, shape index: {}]   ;;  %s1075_s8 = inlined_call_operand.vmem [shape: f32[1,64], index: 8, kind: input, shape index: {}]   ;;  %s1076_s9 = inlined_call_operand.vmem [shape: bf16[64,128], index: 9, kind: input, shape index: {}]   ;;  %s1077_s10 = inlined_call_operand.vmem [shape: f32[1,128], index: 10, kind: input, shape index: {}]   ;;  %s1078_s11 = inlined_call_operand.hbm [shape: f32[8,128], index: 11, kind: output, shape index: {}]  }
   0x1   :  { %17 = vsyncpa [#allocation6], 0 }
   0x2   :  { %18 = vsyncpa [#allocation4], 0  ;;  %s890_s17 = smov [#allocation2]   ;;  %s818_s21 = scalar_lea.hbm %s1068_s1, 2048 }
   0x3   :  { %s26_s18 = sshll.u32 %s890_s17, 4  ;;  %p819_p0 = scmp.ne.s32.totalorder %s1068_s1, %s818_s21  ;;  %s27_s18 = int_to_ptr.vmem [resolvable:$true] %s26_s18 }
   0x4   :  { %p822_p1 = scmp.lt.u32.totalorder %s818_s21, %s1068_s1 }
   0x6   :  { %p824_p2 = pnand %p822_p1, %p819_p0 }
   0x8   :  { %827 = shalt.err (!%p824_p2)
}
   0x9   :  { %s828_s26 = scalar_lea.vmem %s27_s18, 2048  ;;  %p833_p4 = scmp.lt.s32.totalorder %s27_s18, %s27_s18 }
   0xa   :  { %p829_p3 = scmp.ne.s32.totalorder %s27_s18, %s828_s26  ;;  %p834_p5 = scmp.lt.s32.totalorder %s828_s26, %s828_s26 }
   0xc   :  { %p835_p6 = por %p834_p5, %p833_p4 }
   0xe   :  { %p836_p7 = pnand %p835_p6, %p829_p3 }
  0x10   :  { %839 = shalt.err (!%p836_p7)
}
  0x11   :  { %s891_s27 = smov 128   ;;  %s892_s28 = smov 8  }
  0x12   :  { %32 = dma.hbm_to_vmem [thread:$0]  %s1068_s1, 2048, %s27_s18, [#allocation3], %s891_s27, %s891_s27, %s892_s28  }
  0x13   :  { %s893_s12 = smov [#allocation5]   ;;  %s840_s16 = scalar_lea.hbm %s1072_s5, 2048 }
  0x14   :  { %s44_s13 = sshll.u32 %s893_s12, 4  ;;  %p841_p8 = scmp.ne.s32.totalorder %s1072_s5, %s840_s16  ;;  %s45_s13 = int_to_ptr.vmem [resolvable:$true] %s44_s13 }
  0x15   :  { %p844_p9 = scmp.lt.u32.totalorder %s840_s16, %s1072_s5 }
  0x17   :  { %p846_p10 = pnand %p844_p9, %p841_p8 }
  0x19   :  { %849 = shalt.err (!%p846_p10)
}
  0x1a   :  { %s850_s22 = scalar_lea.vmem %s45_s13, 2048  ;;  %p855_p12 = scmp.lt.s32.totalorder %s45_s13, %s45_s13 }
  0x1b   :  { %p851_p11 = scmp.ne.s32.totalorder %s45_s13, %s850_s22  ;;  %p856_p13 = scmp.lt.s32.totalorder %s850_s22, %s850_s22 }
  0x1d   :  { %p857_p0 = por %p856_p13, %p855_p12 }
  0x1f   :  { %p858_p1 = pnand %p857_p0, %p851_p11 }
  0x21   :  { %861 = shalt.err (!%p858_p1)
}
  0x22   :  { %s894_s1 = smov 64   ;;  %s895_s18 = smov 4  }
  0x23   :  { %50 = dma.hbm_to_vmem [thread:$0]  %s1072_s5, 2048, %s45_s13, [#allocation6], %s894_s1, %s894_s1, %s895_s18  }
  0x24   :  { %884 = dma.done.wait [#allocation3], 2048  }
  0x25   :  { %885 = vsyncadd [#allocation3], 4294965248 }
  0x26   :  { %886 = dma.done.wait [#allocation6], 2048  }
  0x27   :  { %887 = vsyncadd [#allocation6], 4294965248  ;;  %v896_v0 = vmov 0   ;;  %v766_v1 = vld [vmem:[#allocation2 + $0x4] ss:$8 sps:$4 sm:$0xff]   ;;  %v794_v15 = vld [vmem:[#allocation5 + $0x50] sm:$0xff]   ;;  %v87_v41 = vlaneseq }
  0x28   :  { %209 = vmatprep.mubr.bf16.mxu0 %v896_v0  ;;  %v768_v2 = vld [vmem:[#allocation2] ss:$8 sps:$4 sm:$0xff]   ;;  %177 = vmatprep.subr.bf16.mxu0 %v766_v1  ;;  %v769_v3 = vld [vmem:[#allocation2 + $0x14] ss:$8 sps:$4 sm:$0xff]   ;;  %v771_v4 = vld [vmem:[#allocation2 + $0x10] ss:$8 sps:$4 sm:$0xff]  }
  0x29   :  { %178 = vmatpush1.bf16.msra.mxu0 %v768_v2  ;;  %v772_v5 = vld [vmem:[#allocation2 + $0x24] ss:$8 sps:$4 sm:$0xff]   ;;  %v774_v6 = vld [vmem:[#allocation2 + $0x20] ss:$8 sps:$4 sm:$0xff]   ;;  %v775_v7 = vld [vmem:[#allocation2 + $0x34] ss:$8 sps:$4 sm:$0xff]  }
  0x2a   :  { %179 = vmatprep.subr.bf16.mxu0 %v769_v3  ;;  %v777_v8 = vld [vmem:[#allocation2 + $0x30] ss:$8 sps:$4 sm:$0xff]   ;;  %v778_v9 = vld [vmem:[#allocation2 + $0x44] ss:$8 sps:$4 sm:$0xff]   ;;  %v780_v12 = vld [vmem:[#allocation2 + $0x40] ss:$8 sps:$4 sm:$0xff]  }
  0x2b   :  { %v790_v10 = vld [vmem:[#allocation5 + $0x40] sm:$0xff]   ;;  %v792_v13 = vld [vmem:[#allocation5 + $0x48] sm:$0xff]   ;;  %v781_v16 = vld [vmem:[#allocation2 + $0x54] ss:$8 sps:$4 sm:$0xff]   ;;  %v897_v35 = vmov 0.0   ;;  %v88_v42 = vshrl.u32 %v87_v41, 7 }
  0x2c   :  { %v791_v11 = vld [vmem:[#allocation5] sm:$0xff]   ;;  %688 = vmatprep.subr.bf16.mxu1 %v790_v10  ;;  %v793_v14 = vld [vmem:[#allocation5 + $0x8] sm:$0xff]   ;;  %v783_v17 = vld [vmem:[#allocation2 + $0x50] ss:$8 sps:$4 sm:$0xff]   ;;  %vm898_vm0 = vmmov 0   ;;  %vm579_vm1 = vcmask 523264  }
  0x2d   :  { %180 = vmatpush1.bf16.msra.mxu0 %v771_v4  ;;  %689 = vmatpush3.bf16.msra.mxu1 %v791_v11  ;;  %v784_v18 = vld [vmem:[#allocation2 + $0x64] ss:$8 sps:$4 sm:$0xff]   ;;  %v795_v19 = vld [vmem:[#allocation5 + $0x10] sm:$0xff]   ;;  %v796_v20 = vld [vmem:[#allocation5 + $0x58] sm:$0xff]   ;;  %v89_v43 = vsub.s32 0, %v88_v42  ;;  %v93_v45 = vsub.s32 1, %v88_v42 }
  0x2e   :  { %181 = vmatprep.subr.bf16.mxu0 %v772_v5  ;;  %690 = vmatprep.subr.bf16.mxu1 %v792_v13  ;;  %v797_v21 = vld [vmem:[#allocation5 + $0x18] sm:$0xff]   ;;  %v786_v22 = vld [vmem:[#allocation2 + $0x60] ss:$8 sps:$4 sm:$0xff]   ;;  %v802_v30 = vld [vmem:[#allocation5 + $0x70] sm:$0xff]   ;;  %s899_s15 = smov [#allocation7]  }
  0x2f   :  { %v798_v23 = vld [vmem:[#allocation5 + $0x60] sm:$0xff]   ;;  %v787_v24 = vld [vmem:[#allocation2 + $0x74] ss:$8 sps:$4 sm:$0xff]   ;;  %v789_v26 = vld [vmem:[#allocation2 + $0x70] ss:$8 sps:$4 sm:$0xff]  }
  0x30   :  { %v799_v25 = vld [vmem:[#allocation5 + $0x20] sm:$0xff]   ;;  %v800_v28 = vld [vmem:[#allocation5 + $0x68] sm:$0xff]   ;;  %v803_v31 = vld [vmem:[#allocation5 + $0x30] sm:$0xff]  }
  0x31   :  { %182 = vmatpush1.bf16.msra.mxu0 %v774_v6  ;;  %691 = vmatpush3.bf16.msra.mxu1 %v793_v14  ;;  %v68_v27 = vld [vmem:[%s1067_s0] sm:$0xf]  ;;  %v801_v29 = vld [vmem:[#allocation5 + $0x28] sm:$0xff]   ;;  %v804_v32 = vld [vmem:[#allocation5 + $0x78] sm:$0xff]  }
  0x32   :  { %183 = vmatprep.subr.bf16.mxu0 %v775_v7  ;;  %692 = vmatprep.subr.bf16.mxu1 %v794_v15  ;;  %v805_v33 = vld [vmem:[#allocation5 + $0x38] sm:$0xff]   ;;  %v806_v34 = vld [vmem:[%s1074_s7] sm:$0xff]   ;;  %v807_v36 = vld [vmem:[%s1074_s7 + $0x8] sm:$0xff]  }
  0x33   :  { %v808_v37 = vld [vmem:[%s1074_s7 + $0x10] sm:$0xff]   ;;  %v809_v38 = vld [vmem:[%s1074_s7 + $0x18] sm:$0xff]   ;;  %v810_v39 = vld [vmem:[%s1074_s7 + $0x20] sm:$0xff]  }
  0x34   :  { %v811_v40 = vld [vmem:[%s1074_s7 + $0x28] sm:$0xff]   ;;  %v85_v44 = vld [vmem:[%s1069_s2] sm:$0x3]  ;;  %v812_v4 = vld [vmem:[%s1074_s7 + $0x30] sm:$0xff]  }
  0x35   :  { %184 = vmatpush1.bf16.msra.mxu0 %v777_v8  ;;  %693 = vmatpush3.bf16.msra.mxu1 %v795_v19  ;;  %v90_v46 = vrot.slane %v85_v44, %v89_v43  ;;  %v220_v47 = vld [vmem:[%s1070_s3] sm:$0x3]  ;;  %v94_v48 = vrot.slane %v85_v44, %v93_v45  ;;  %v813_v5 = vld [vmem:[%s1074_s7 + $0x38] sm:$0xff]   ;;  %v815_v7 = vld [vmem:[%s1076_s9 + $0x8] sm:$0xff]  }
  0x36   :  { %185 = vmatprep.subr.bf16.mxu0 %v778_v9  ;;  %694 = vmatprep.subr.bf16.mxu1 %v796_v20  ;;  %v234_v50 = vld [vmem:[%s1071_s4] sm:$0x3]  ;;  %v225_v52 = vrot.slane %v220_v47, %v89_v43  ;;  %v229_v56 = vrot.slane %v220_v47, %v93_v45 }
  0x37   :  { %v239_v59 = vrot.slane %v234_v50, %v89_v43  ;;  %v243_v61 = vrot.slane %v234_v50, %v93_v45  ;;  %v814_v6 = vld [vmem:[%s1076_s9] sm:$0xff]  }
  0x38   :  { %v656_v9 = vld [vmem:[%s1073_s6] ss:$0 sm:$0xff] }
  0x39   :  { %186 = vmatpush1.bf16.msra.mxu0 %v780_v12  ;;  %695 = vmatpush3.bf16.msra.mxu1 %v797_v21  ;;  %v673_v19 = vld [vmem:[%s1075_s8] ss:$0 sm:$0xff] }
  0x3a   :  { %187 = vmatprep.subr.bf16.mxu0 %v781_v16  ;;  %696 = vmatprep.subr.bf16.mxu1 %v798_v23 }
  0x3d   :  { %188 = vmatpush1.bf16.msra.mxu0 %v783_v17  ;;  %697 = vmatpush3.bf16.msra.mxu1 %v799_v25  ;;  %v816_v17 = vld [vmem:[%s1076_s9 + $0x10] sm:$0xff]  }
  0x3e   :  { %189 = vmatprep.subr.bf16.mxu0 %v784_v18  ;;  %698 = vmatprep.subr.bf16.mxu1 %v800_v28  ;;  %v817_v18 = vld [vmem:[%s1076_s9 + $0x18] sm:$0xff]   ;;  %s630_s9 = sshll.u32 %s899_s15, 4  ;;  %s631_s9 = int_to_ptr.vmem [resolvable:$true] %s630_s9 }
  0x3f   :  { %s862_s8 = scalar_lea.vmem %s631_s9, 128  ;;  %p867_p3 = scmp.lt.s32.totalorder %s631_s9, %s631_s9 }
  0x40   :  { %p863_p2 = scmp.ne.s32.totalorder %s631_s9, %s862_s8  ;;  %p868_p4 = scmp.lt.s32.totalorder %s862_s8, %s862_s8 }
  0x41   :  { %190 = vmatpush1.bf16.msra.mxu0 %v786_v22  ;;  %699 = vmatpush3.bf16.msra.mxu1 %v801_v29 }
  0x42   :  { %191 = vmatprep.subr.bf16.mxu0 %v787_v24  ;;  %700 = vmatprep.subr.bf16.mxu1 %v802_v30  ;;  %p869_p5 = por %p868_p4, %p867_p3 }
  0x44   :  { %p870_p6 = pnand %p869_p5, %p863_p2 }
  0x45   :  { %192 = vmatpush1.bf16.msra.mxu0 %v789_v26  ;;  %701 = vmatpush3.bf16.msra.mxu1 %v803_v31 }
  0x46   :  { %702 = vmatprep.subr.bf16.mxu1 %v804_v32  ;;  %724 = vmatprep.subr.bf16.mxu0 %v897_v35 }
  0x48   :  { %210 = vmatmul.mubr.bf16.vlgmr.msra.gmra.mrb[0].mxu0 %v68_v27  ;;  %v682_v27 = vld [vmem:[%s1077_s10] ss:$0 sm:$0xff] }
  0x49   :  { %703 = vmatpush3.bf16.msra.mxu1 %v805_v33  ;;  %725 = vmatpush3.bf16.msra.mxu0 %v806_v34 }
  0x4a   :  { %744 = vmatprep.subr.bf16.mxu1 %v897_v35  ;;  %726 = vmatprep.subr.bf16.mxu0 %v897_v35 }
  0x4b   :  { %740 = vmatprep.mubr.msk.bf16.mxu0 %vm898_vm0, %v897_v35 }
  0x4d   :  { %727 = vmatpush3.bf16.msra.mxu0 %v807_v36 }
  0x4e   :  { %728 = vmatprep.subr.bf16.mxu0 %v897_v35 }
  0x51   :  { %729 = vmatpush3.bf16.msra.mxu0 %v808_v37 }
  0x52   :  { %730 = vmatprep.subr.bf16.mxu0 %v897_v35 }
  0x55   :  { %731 = vmatpush3.bf16.msra.mxu0 %v809_v38 }
  0x56   :  { %732 = vmatprep.subr.bf16.mxu0 %v897_v35 }
  0x59   :  { %733 = vmatpush3.bf16.msra.mxu0 %v810_v39 }
  0x5a   :  { %734 = vmatprep.subr.bf16.mxu0 %v897_v35 }
  0x5d   :  { %735 = vmatpush3.bf16.msra.mxu0 %v811_v40 }
  0x5e   :  { %736 = vmatprep.subr.bf16.mxu0 %v897_v35 }
  0x61   :  { %737 = vmatpush3.bf16.msra.mxu0 %v812_v4 }
  0x62   :  { %738 = vmatprep.subr.bf16.mxu0 %v897_v35 }
  0x65   :  { %739 = vmatpush3.bf16.msra.mxu0 %v813_v5 }
 0x11b   :  { %v211_v49 = vpop.f32.mrb[0].mxu0 }
 0x11c   :  { %v212_v51 = vadd.f32 %v211_v49, %v90_v46  ;;  %v213_v53 = vpop.f32.mrb[1].mxu0 }
 0x11d   :  { %v214_v54 = vadd.f32 %v213_v53, %v94_v48  ;;  %v215_v55 = vpop.f32.mrb[2].mxu0 }
 0x11e   :  { %v218_v57 = vmax.f32 %v212_v51, 0.0  ;;  %v216_v58 = vpop.f32.mrb[3].mxu0 }
 0x11f   :  { %v219_v60 = vmax.f32 %v214_v54, 0.0 }
 0x120   :  { %v232_v62 = vmul.f32 %v225_v52, %v218_v57 }
 0x121   :  { %v233_v63 = vmul.f32 %v229_v56, %v219_v60 }
 0x122   :  { %v246_v0 = vadd.f32 %v239_v59, %v232_v62 }
 0x123   :  { %v247_v1 = vadd.f32 %v243_v61, %v233_v63 }
 0x124   :  { %v248_v3 = vpack.c.bf16 %v246_v0, %v246_v0 }
 0x125   :  { %v249_v2 = vpack.c.bf16 %v247_v1, %v247_v1 }
 0x127   :  { %417 = vmatprep.mubr.bf16.mxu1 %v249_v2 }
 0x128   :  { %418 = vmatmul.mubr.bf16.vlgmr.msra.gmra.mrb[0].mxu1 %v248_v3 }
 0x129   :  { %752 = vmatprep.mubr.msk.bf16.mxu1 %vm898_vm0, %v897_v35  ;;  %745 = vmatpush3.bf16.msra.mxu1 %v814_v6 }
 0x12a   :  { %746 = vmatprep.subr.bf16.mxu1 %v897_v35 }
 0x12d   :  { %747 = vmatpush3.bf16.msra.mxu1 %v815_v7 }
 0x12e   :  { %748 = vmatprep.subr.bf16.mxu1 %v897_v35 }
 0x131   :  { %749 = vmatpush3.bf16.msra.mxu1 %v816_v17 }
 0x132   :  { %750 = vmatprep.subr.bf16.mxu1 %v897_v35 }
 0x135   :  { %751 = vmatpush3.bf16.msra.mxu1 %v817_v18 }
 0x1fb   :  { %v704_v8 = vpop.f32.mrb[0].mxu1 }
 0x1fc   :  { %v705_v10 = vpop.f32.mrb[1].mxu1 }
 0x1fd   :  { %v706_v11 = vadd.f32 %v705_v10, %v704_v8  ;;  %v707_v12 = vpop.f32.mrb[2].mxu1 }
 0x1fe   :  { %v708_v13 = vpop.f32.mrb[3].mxu1 }
 0x1ff   :  { %v420_v14 = vadd.f32 %v706_v11, %v656_v9 }
 0x201   :  { %v425_v15 = vmax.f32 %v420_v14, 0.0 }
 0x203   :  { %v426_v16 = vpack.c.bf16 %v425_v15, %v425_v15 }
 0x205   :  { %741 = vmatmul.mubr.bf16.vlgmr.msra.gmra.mrb[4].mxu0 %v426_v16 }
 0x2d8   :  { %v532_v20 = vpop.f32.mrb[4].mxu0 }
 0x2d9   :  { %v533_v21 = vadd.f32 %v673_v19, %v532_v20  ;;  %v742_v22 = vpop.f32.mrb[5].mxu0 }
 0x2da   :  { %v535_v23 = vpop.f32.mrb[6].mxu0 }
 0x2db   :  { %v538_v24 = vmax.f32 %v533_v21, 0.0  ;;  %v743_v25 = vpop.f32.mrb[7].mxu0 }
 0x2dd   :  { %v539_v26 = vpack.c.bf16 %v538_v24, %v538_v24 }
 0x2df   :  { %753 = vmatmul.mubr.msk.bf16.vlgmr.msra.gmra.mrb[4].mxu1 %vm579_vm1, %v539_v26 }
 0x3b2   :  { %v617_v28 = vpop.f32.mrb[4].mxu1 }
 0x3b3   :  { %v618_v29 = vadd.f32 %v682_v27, %v617_v28  ;;  %v754_v30 = vpop.f32.mrb[5].mxu1 }
 0x3b4   :  { %v620_v31 = vpop.f32.mrb[6].mxu1 }
 0x3b5   :  { %623 = vst [vmem:[#allocation7] sm:$0xff] %v618_v29  ;;  %v755_v32 = vpop.f32.mrb[7].mxu1 }
 0x3b6   :  { %873 = shalt.err (!%p870_p6)
}
 0x3b7   :  { %s874_s10 = scalar_lea.hbm %s1078_s11, 128 }
 0x3b8   :  { %p875_p7 = scmp.ne.s32.totalorder %s1078_s11, %s874_s10  ;;  %p878_p8 = scmp.lt.u32.totalorder %s874_s10, %s1078_s11 }
 0x3ba   :  { %p880_p9 = pnand %p878_p8, %p875_p7 }
 0x3bc   :  { %883 = shalt.err (!%p880_p9)
}
 0x3bd   :  { %633 = dma.vmem_to_hbm [thread:$0]  %s631_s9, 128, %s1078_s11, [#allocation4]  }
 0x3be   :  { %888 = dma.done.wait [#allocation4], 128  }
 0x3bf   :  { %889 = vsyncadd [#allocation4], 4294967168 }
 0x3c0   :  { %637 = vsyncpa [#allocation3], 1 }
 0x3c1   :  { %638 = vsyncpa [#allocation6], 1 }
 0x3c2   :  { %639 = vsyncpa [#allocation4], 1 }

</bundles_post_ra>
